<compile_context>
chip_gen: v7x
topology: tpu7x:2x2x1
jax: 0.10.0
libtpu: 0.0.40
codegen_flags: <defaults>
</compile_context>

<pallas_src>
import functools

import jax
import jax.numpy as jnp
import numpy as np
from jax import lax
from jax.experimental import pallas as pl
from jax.experimental.pallas import tpu as pltpu


def _round_up(x, m):
    return (x + m - 1) // m * m


def mha_kernel(num_heads, dim_per_head, hidden_real, eps, compute_dtype,
               key_ref, value_ref, query_ref,
               wk_ref, bk_ref, wv_ref, bv_ref, wq_ref, bq_ref,
               wf_ref, bf_ref, gamma_ref, beta_ref,
               out_ref, attn_ref):
    TB, N, Hp = key_ref.shape
    f32 = jnp.float32
    c = lambda x: x.astype(compute_dtype)   # MXU operand dtype (f32 or bf16)

    # ---- linear projections (scale already folded into wq/bq host-side) ----
    k2 = key_ref[...].reshape(TB * N, Hp)
    v2 = value_ref[...].reshape(TB * N, Hp)
    q2 = query_ref[...].reshape(TB, Hp)                     # raw query (residual)

    kp = (jnp.dot(c(k2), wk_ref[...], preferred_element_type=f32)
          + bk_ref[...]).reshape(TB, N, Hp)
    vp = (jnp.dot(c(v2), wv_ref[...], preferred_element_type=f32)
          + bv_ref[...]).reshape(TB, N, Hp)
    qp = jnp.dot(c(q2), wq_ref[...], preferred_element_type=f32) + bq_ref[...]  # [TB, Hp]

    # ---- head selector built in-kernel: selT[h, d] = 1 iff column d is in head h
    # (padded columns d >= hidden_real map to no head -> 0). No HBM input, no DMA.
    d_idx = lax.broadcasted_iota(jnp.int32, (num_heads, Hp), 1)
    h_idx = lax.broadcasted_iota(jnp.int32, (num_heads, Hp), 0)
    lower = h_idx * dim_per_head
    selT = ((d_idx >= lower) & (d_idx < lower + dim_per_head)).astype(f32)  # [heads, Hp]

    # ---- per-head scores [TB, heads, N]:
    # scores[b,h,n] = sum_{d in head h} qp[b,d] * kp[b,n,d]
    qh = qp[:, None, :] * selT[None, :, :]                  # [TB, heads, Hp]
    scores = jnp.einsum('bhd,bnd->bhn', c(qh), c(kp),
                        preferred_element_type=f32)         # [TB, heads, N]

    # ---- softmax over the key axis (lane axis); reciprocal goes to the EUP slot
    m = jnp.max(scores, axis=-1, keepdims=True)
    e = jnp.exp(scores - m)
    s = jnp.sum(e, axis=-1, keepdims=True)
    attn = e * pl.reciprocal(s, approx=True)                # [TB, heads, N]
    # TODO(synk): dropout = identity (eval mode); attn_mask path not implemented.
    attn_ref[...] = attn                                    # lane-dense [TB, heads, N]

    # ---- context: per-head attn @ V (flash-style batched matmul), then each
    # output column keeps only its own head's contribution via selT.
    ctx_heads = jnp.einsum('bhn,bnd->bhd', c(attn), c(vp),
                           preferred_element_type=f32)      # [TB, heads, Hp]
    context = jnp.sum(ctx_heads * selT[None, :, :], axis=1)  # [TB, Hp]

    # ---- final linear + residual + LayerNorm (padded lanes masked out) ----
    out = jnp.dot(c(context), wf_ref[...], preferred_element_type=f32) + bf_ref[...]
    y = q2 + out                                            # residual = raw query
    inv_h = 1.0 / float(hidden_real)
    mu = jnp.sum(y, axis=-1, keepdims=True) * inv_h         # padded lanes of y are 0
    centered = y - mu
    if Hp != hidden_real:
        lane = lax.broadcasted_iota(jnp.int32, (TB, Hp), 1)
        centered = jnp.where(lane < hidden_real, centered, 0.0)
    var = jnp.sum(centered * centered, axis=-1, keepdims=True) * inv_h
    yn = centered * lax.rsqrt(var + eps)
    out_ref[...] = (yn * gamma_ref[...] + beta_ref[...]).reshape(TB, 1, Hp)


def multi_head_attention(key, value, query, params, num_heads, *,
                         max_batch_block=8, mxu_dtype=jnp.float32):
    wk, bk, wv, bv, wq, bq, wf, bf, gamma, beta = params
    B, N, H = key.shape
    assert H % num_heads == 0
    dph = H // num_heads
    # matches torch: scale = (dim_per_head // num_heads) ** (-0.5)
    scale = float((dph // num_heads) ** (-0.5))
    eps = 1e-5

    # ---- lane-dense hidden dim: zero-pad H to a multiple of 128 (no-op if aligned)
    Hp = max(_round_up(H, 128), 128)
    pad = Hp - H

    def pad_last(x):
        return jnp.pad(x, [(0, 0)] * (x.ndim - 1) + [(0, pad)]) if pad else x

    def pad_mat(w):
        return jnp.pad(w, [(0, pad), (0, pad)]) if pad else w

    key_p, value_p, query_p = pad_last(key), pad_last(value), pad_last(query)

    # fold the softmax scale into the Q projection (removes an in-kernel VPU mul)
    wq_s, bq_s = wq * scale, bq * scale
    wk_p = pad_mat(wk).astype(mxu_dtype)
    wv_p = pad_mat(wv).astype(mxu_dtype)
    wq_p = pad_mat(wq_s).astype(mxu_dtype)
    wf_p = pad_mat(wf).astype(mxu_dtype)
    bk_p = pad_last(bk).astype(jnp.float32)
    bv_p = pad_last(bv).astype(jnp.float32)
    bq_p = pad_last(bq_s).astype(jnp.float32)
    bf_p = pad_last(bf).astype(jnp.float32)
    gamma_p = pad_last(gamma).astype(jnp.float32)
    beta_p = pad_last(beta).astype(jnp.float32)

    # ---- batch tile: largest divisor of B that fits the per-step VMEM budget.
    # (On v7x, also prefer an even number of grid steps so both TCs stay busy.)
    TB = 1
    for t in range(1, min(B, max_batch_block) + 1):
        if B % t == 0:
            TB = t
    grid = (B // TB,)

    kernel = functools.partial(mha_kernel, num_heads, dph, H, eps, mxu_dtype)

    const2d = lambda shape: pl.BlockSpec(shape, lambda b: (0, 0))      # fetched once
    per_batch = lambda shape: pl.BlockSpec(shape, lambda b: (b, 0, 0))

    out_p, attn = pl.pallas_call(
        kernel,
        out_shape=(
            jax.ShapeDtypeStruct((B, 1, Hp), jnp.float32),
            jax.ShapeDtypeStruct((B, num_heads, N), jnp.float32),
        ),
        grid_spec=pltpu.PrefetchScalarGridSpec(
            num_scalar_prefetch=0,
            grid=grid,
            in_specs=[
                per_batch((TB, N, Hp)),            # key
                per_batch((TB, N, Hp)),            # value
                per_batch((TB, 1, Hp)),            # query
                const2d((Hp, Hp)), const2d((1, Hp)),   # wk, bk
                const2d((Hp, Hp)), const2d((1, Hp)),   # wv, bv
                const2d((Hp, Hp)), const2d((1, Hp)),   # wq (scaled), bq (scaled)
                const2d((Hp, Hp)), const2d((1, Hp)),   # wf, bf
                const2d((1, Hp)), const2d((1, Hp)),    # gamma, beta
            ],
            out_specs=[
                per_batch((TB, 1, Hp)),
                per_batch((TB, num_heads, N)),     # lane-dense attention layout
            ],
        ),
        compiler_params=pltpu.CompilerParams(
            dimension_semantics=("parallel",),
            vmem_limit_bytes=64 * 1024 * 1024,
        ),
    )(key_p, value_p, query_p,
      wk_p, bk_p, wv_p, bv_p, wq_p, bq_p, wf_p, bf_p, gamma_p, beta_p)

    out = out_p[:, :, :H]                                   # drop padded lanes
    attention = attn.reshape(B * num_heads, 1, N)           # pure reshape, no transpose
    return out, attention


def reference(key, value, query, params, num_heads):
    """Pure-JAX replica of the PyTorch forward (eval mode)."""
    wk, bk, wv, bv, wq, bq, wf, bf, gamma, beta = params
    B, N, H = key.shape
    dph = H // num_heads
    residual = query
    k = key @ wk + bk
    v = value @ wv + bv
    q = query @ wq + bq
    k = k.reshape(B, N, num_heads, dph).transpose(0, 2, 1, 3).reshape(B * num_heads, N, dph)
    v = v.reshape(B, N, num_heads, dph).transpose(0, 2, 1, 3).reshape(B * num_heads, N, dph)
    q = q.reshape(B, 1, num_heads, dph).transpose(0, 2, 1, 3).reshape(B * num_heads, 1, dph)
    scale = (dph // num_heads) ** (-0.5)
    attention = jnp.einsum("bqd,bkd->bqk", q, k) * scale
    attention = jax.nn.softmax(attention, axis=2)
    context = jnp.einsum("bqk,bkd->bqd", attention, v)
    context = context.reshape(B, num_heads, 1, dph).transpose(0, 2, 1, 3).reshape(B, 1, H)
    output = context @ wf + bf
    y = residual + output
    mu = jnp.mean(y, axis=-1, keepdims=True)
    var = jnp.mean((y - mu) ** 2, axis=-1, keepdims=True)
    out = (y - mu) / jnp.sqrt(var + 1e-5) * gamma[0] + beta[0]
    return out, attention


if __name__ == "__main__":
    B, N, H, num_heads = 2, 8, 32, 4   # batch, box_num, image_hidden, num_heads

    root = jax.random.PRNGKey(0)
    ks = jax.random.split(root, 12)
    init = lambda k, shape, s=0.1: (s * jax.random.normal(k, shape)).astype(jnp.float32)

    key = init(ks[0], (B, N, H), 1.0)
    value = init(ks[1], (B, N, H), 1.0)
    query = init(ks[2], (B, 1, H), 1.0)

    params = (
        init(ks[3], (H, H)), init(ks[4], (1, H)),     # linear_k
        init(ks[5], (H, H)), init(ks[6], (1, H)),     # linear_v
        init(ks[7], (H, H)), init(ks[8], (1, H)),     # linear_q
        init(ks[9], (H, H)), init(ks[10], (1, H)),    # linear_final
        jnp.ones((1, H), jnp.float32),                # layer_norm gamma
        jnp.zeros((1, H), jnp.float32),               # layer_norm beta
    )

    out, attention = multi_head_attention(key, value, query, params, num_heads)
    jax.block_until_ready((out, attention))

    ref_out, ref_attn = reference(key, value, query, params, num_heads)
    assert out.shape == (B, 1, H)
    assert attention.shape == (B * num_heads, 1, N)
    # approx EUP reciprocal in the softmax adds ~1e-4 relative error -> 5e-3 tolerance
    np.testing.assert_allclose(np.asarray(out), np.asarray(ref_out), atol=5e-3, rtol=5e-3)
    np.testing.assert_allclose(np.asarray(attention), np.asarray(ref_attn), atol=5e-3, rtol=5e-3)

    # bf16 MXU-operand path (recommended on v6e/v7x); f32 accumulation, loose check.
    out_bf, attn_bf = multi_head_attention(key, value, query, params, num_heads,
                                           mxu_dtype=jnp.bfloat16)
    jax.block_until_ready((out_bf, attn_bf))
    np.testing.assert_allclose(np.asarray(out_bf), np.asarray(ref_out), atol=1e-1, rtol=1e-1)
    np.testing.assert_allclose(np.asarray(attn_bf), np.asarray(ref_attn), atol=1e-1, rtol=1e-1)

    print("KERNEL_OK")
</pallas_src>

<mosaic_0001>
module attributes {stable_mosaic.version = 11 : i64} {
  func.func @mha_kernel(%arg0: i32, %arg1: memref<2x8x128xf32, #tpu.memory_space<vmem>>, %arg2: memref<2x8x128xf32, #tpu.memory_space<vmem>>, %arg3: memref<2x1x128xf32, #tpu.memory_space<vmem>>, %arg4: memref<128x128xf32, #tpu.memory_space<vmem>>, %arg5: memref<1x128xf32, #tpu.memory_space<vmem>>, %arg6: memref<128x128xf32, #tpu.memory_space<vmem>>, %arg7: memref<1x128xf32, #tpu.memory_space<vmem>>, %arg8: memref<128x128xf32, #tpu.memory_space<vmem>>, %arg9: memref<1x128xf32, #tpu.memory_space<vmem>>, %arg10: memref<128x128xf32, #tpu.memory_space<vmem>>, %arg11: memref<1x128xf32, #tpu.memory_space<vmem>>, %arg12: memref<1x128xf32, #tpu.memory_space<vmem>>, %arg13: memref<1x128xf32, #tpu.memory_space<vmem>>, %arg14: memref<2x1x128xf32, #tpu.memory_space<vmem>>, %arg15: memref<2x4x8xf32, #tpu.memory_space<vmem>>) attributes {dimension_semantics = [#tpu.dimension_semantics<parallel>], iteration_bounds = array<i64: 1>, scalar_prefetch = 0 : i64, scratch_operands = 0 : i64, tpu.core_type = #tpu.core_type<tc>, window_params = [{transform_indices = @transform_0, window_bounds = array<i64: 2, 8, 128>}, {transform_indices = @transform_1, window_bounds = array<i64: 2, 8, 128>}, {transform_indices = @transform_2, window_bounds = array<i64: 2, 1, 128>}, {pipeline_mode = #tpu.pipeline_mode<synchronous>, transform_indices = @transform_3, window_bounds = array<i64: 128, 128>}, {pipeline_mode = #tpu.pipeline_mode<synchronous>, transform_indices = @transform_4, window_bounds = array<i64: 1, 128>}, {pipeline_mode = #tpu.pipeline_mode<synchronous>, transform_indices = @transform_5, window_bounds = array<i64: 128, 128>}, {pipeline_mode = #tpu.pipeline_mode<synchronous>, transform_indices = @transform_6, window_bounds = array<i64: 1, 128>}, {pipeline_mode = #tpu.pipeline_mode<synchronous>, transform_indices = @transform_7, window_bounds = array<i64: 128, 128>}, {pipeline_mode = #tpu.pipeline_mode<synchronous>, transform_indices = @transform_8, window_bounds = array<i64: 1, 128>}, {pipeline_mode = #tpu.pipeline_mode<synchronous>, transform_indices = @transform_9, window_bounds = array<i64: 128, 128>}, {pipeline_mode = #tpu.pipeline_mode<synchronous>, transform_indices = @transform_10, window_bounds = array<i64: 1, 128>}, {pipeline_mode = #tpu.pipeline_mode<synchronous>, transform_indices = @transform_11, window_bounds = array<i64: 1, 128>}, {pipeline_mode = #tpu.pipeline_mode<synchronous>, transform_indices = @transform_12, window_bounds = array<i64: 1, 128>}, {transform_indices = @transform_13, window_bounds = array<i64: 2, 1, 128>}, {transform_indices = @transform_14, window_bounds = array<i64: 2, 4, 8>}]} {
    %c0 = arith.constant 0 : index
    %c0_0 = arith.constant 0 : index
    %c0_1 = arith.constant 0 : index
    %0 = vector.load %arg1[%c0, %c0_0, %c0_1] : memref<2x8x128xf32, #tpu.memory_space<vmem>>, vector<2x8x128xf32>
    %1 = vector.shape_cast %0 : vector<2x8x128xf32> to vector<16x128xf32>
    %c0_2 = arith.constant 0 : index
    %c0_3 = arith.constant 0 : index
    %c0_4 = arith.constant 0 : index
    %2 = vector.load %arg2[%c0_2, %c0_3, %c0_4] : memref<2x8x128xf32, #tpu.memory_space<vmem>>, vector<2x8x128xf32>
    %3 = vector.shape_cast %2 : vector<2x8x128xf32> to vector<16x128xf32>
    %c0_5 = arith.constant 0 : index
    %c0_6 = arith.constant 0 : index
    %c0_7 = arith.constant 0 : index
    %4 = vector.load %arg3[%c0_5, %c0_6, %c0_7] : memref<2x1x128xf32, #tpu.memory_space<vmem>>, vector<2x1x128xf32>
    %5 = vector.shape_cast %4 : vector<2x1x128xf32> to vector<2x128xf32>
    %c0_8 = arith.constant 0 : index
    %c0_9 = arith.constant 0 : index
    %6 = vector.load %arg4[%c0_8, %c0_9] : memref<128x128xf32, #tpu.memory_space<vmem>>, vector<128x128xf32>
    %cst = arith.constant dense<0.000000e+00> : vector<16x128xf32>
    %7 = tpu.matmul %1, %6, %cst {dimension_numbers = #tpu.dot_dimension_numbers<[1], [0], [0], [1], [0, 0, 1, 1], [], []>} : vector<16x128xf32>, vector<128x128xf32>, vector<16x128xf32> -> vector<16x128xf32>
    %c0_10 = arith.constant 0 : index
    %c0_11 = arith.constant 0 : index
    %8 = vector.load %arg5[%c0_10, %c0_11] : memref<1x128xf32, #tpu.memory_space<vmem>>, vector<1x128xf32>
    %9 = vector.broadcast %8 : vector<1x128xf32> to vector<16x128xf32>
    %10 = arith.addf %7, %9 : vector<16x128xf32>
    %11 = vector.shape_cast %10 : vector<16x128xf32> to vector<2x8x128xf32>
    %c0_12 = arith.constant 0 : index
    %c0_13 = arith.constant 0 : index
    %12 = vector.load %arg6[%c0_12, %c0_13] : memref<128x128xf32, #tpu.memory_space<vmem>>, vector<128x128xf32>
    %cst_14 = arith.constant dense<0.000000e+00> : vector<16x128xf32>
    %13 = tpu.matmul %3, %12, %cst_14 {dimension_numbers = #tpu.dot_dimension_numbers<[1], [0], [0], [1], [0, 0, 1, 1], [], []>} : vector<16x128xf32>, vector<128x128xf32>, vector<16x128xf32> -> vector<16x128xf32>
    %c0_15 = arith.constant 0 : index
    %c0_16 = arith.constant 0 : index
    %14 = vector.load %arg7[%c0_15, %c0_16] : memref<1x128xf32, #tpu.memory_space<vmem>>, vector<1x128xf32>
    %15 = vector.broadcast %14 : vector<1x128xf32> to vector<16x128xf32>
    %16 = arith.addf %13, %15 : vector<16x128xf32>
    %17 = vector.shape_cast %16 : vector<16x128xf32> to vector<2x8x128xf32>
    %c0_17 = arith.constant 0 : index
    %c0_18 = arith.constant 0 : index
    %18 = vector.load %arg8[%c0_17, %c0_18] : memref<128x128xf32, #tpu.memory_space<vmem>>, vector<128x128xf32>
    %cst_19 = arith.constant dense<0.000000e+00> : vector<2x128xf32>
    %19 = tpu.matmul %5, %18, %cst_19 {dimension_numbers = #tpu.dot_dimension_numbers<[1], [0], [0], [1], [0, 0, 1, 1], [], []>} : vector<2x128xf32>, vector<128x128xf32>, vector<2x128xf32> -> vector<2x128xf32>
    %c0_20 = arith.constant 0 : index
    %c0_21 = arith.constant 0 : index
    %20 = vector.load %arg9[%c0_20, %c0_21] : memref<1x128xf32, #tpu.memory_space<vmem>>, vector<1x128xf32>
    %21 = vector.broadcast %20 : vector<1x128xf32> to vector<2x128xf32>
    %22 = arith.addf %19, %21 : vector<2x128xf32>
    %23 = tpu.iota {dimensions = array<i32: 1>} : vector<4x128xi32>
    %24 = tpu.iota {dimensions = array<i32: 0>} : vector<4x128xi32>
    %c8_i32 = arith.constant 8 : i32
    %25 = vector.broadcast %c8_i32 : i32 to vector<4x128xi32>
    %26 = arith.muli %24, %25 : vector<4x128xi32>
    %27 = arith.cmpi sge, %23, %26 : vector<4x128xi32>
    %c8_i32_22 = arith.constant 8 : i32
    %28 = vector.broadcast %c8_i32_22 : i32 to vector<4x128xi32>
    %29 = arith.addi %26, %28 : vector<4x128xi32>
    %30 = arith.cmpi slt, %23, %29 : vector<4x128xi32>
    %31 = arith.andi %27, %30 : vector<4x128xi1>
    %32 = arith.extui %31 : vector<4x128xi1> to vector<4x128xi32>
    %33 = arith.sitofp %32 : vector<4x128xi32> to vector<4x128xf32>
    %34 = vector.shape_cast %22 : vector<2x128xf32> to vector<2x1x128xf32>
    %35 = vector.shape_cast %33 : vector<4x128xf32> to vector<1x4x128xf32>
    %36 = vector.broadcast %34 : vector<2x1x128xf32> to vector<2x4x128xf32>
    %37 = vector.broadcast %35 : vector<1x4x128xf32> to vector<2x4x128xf32>
    %38 = arith.mulf %36, %37 : vector<2x4x128xf32>
    "tpu.trace_start"() <{level = 10 : i32, message = "bhd,bnd->bhn"}> : () -> ()
    %cst_23 = arith.constant dense<0.000000e+00> : vector<2x4x8xf32>
    %39 = tpu.matmul %38, %11, %cst_23 {dimension_numbers = #tpu.dot_dimension_numbers<[2], [2], [1], [1], [0, 0, 0, 1, 1, 1], [0], [0]>} : vector<2x4x128xf32>, vector<2x8x128xf32>, vector<2x4x8xf32> -> vector<2x4x8xf32>
    "tpu.trace_stop"() : () -> ()
    %cst_24 = arith.constant dense<0xFF800000> : vector<2x4xf32>
    %40 = vector.multi_reduction <maximumf>, %39, %cst_24 [2] : vector<2x4x8xf32> to vector<2x4xf32>
    %41 = vector.shape_cast %40 : vector<2x4xf32> to vector<2x4x1xf32>
    %42 = vector.broadcast %41 : vector<2x4x1xf32> to vector<2x4x8xf32>
    %43 = arith.subf %39, %42 : vector<2x4x8xf32>
    %44 = math.exp %43 : vector<2x4x8xf32>
    %cst_25 = arith.constant dense<0.000000e+00> : vector<2x4xf32>
    %45 = vector.multi_reduction <add>, %44, %cst_25 [2] : vector<2x4x8xf32> to vector<2x4xf32>
    %46 = vector.shape_cast %45 : vector<2x4xf32> to vector<2x4x1xf32>
    %47 = tpu.reciprocal %46 {approx = true} : vector<2x4x1xf32> -> vector<2x4x1xf32>
    %48 = vector.broadcast %47 : vector<2x4x1xf32> to vector<2x4x8xf32>
    %49 = arith.mulf %44, %48 : vector<2x4x8xf32>
    %c0_26 = arith.constant 0 : index
    %c0_27 = arith.constant 0 : index
    %c0_28 = arith.constant 0 : index
    %50 = vector.load %arg15[%c0_26, %c0_27, %c0_28] : memref<2x4x8xf32, #tpu.memory_space<vmem>>, vector<2x4x8xf32>
    tpu.vector_store %arg15[%c0_26, %c0_27, %c0_28], %49 {strides = array<i32>} : memref<2x4x8xf32, #tpu.memory_space<vmem>>, vector<2x4x8xf32>,
    "tpu.trace_start"() <{level = 10 : i32, message = "bhn,bnd->bhd"}> : () -> ()
    %cst_29 = arith.constant dense<0.000000e+00> : vector<2x4x128xf32>
    %51 = tpu.matmul %49, %17, %cst_29 {dimension_numbers = #tpu.dot_dimension_numbers<[2], [1], [1], [2], [0, 0, 0, 1, 1, 2], [0], [0]>} : vector<2x4x8xf32>, vector<2x8x128xf32>, vector<2x4x128xf32> -> vector<2x4x128xf32>
    "tpu.trace_stop"() : () -> ()
    %52 = vector.shape_cast %33 : vector<4x128xf32> to vector<1x4x128xf32>
    %53 = vector.broadcast %52 : vector<1x4x128xf32> to vector<2x4x128xf32>
    %54 = arith.mulf %51, %53 : vector<2x4x128xf32>
    %cst_30 = arith.constant dense<0.000000e+00> : vector<2x128xf32>
    %55 = vector.multi_reduction <add>, %54, %cst_30 [1] : vector<2x4x128xf32> to vector<2x128xf32>
    %c0_31 = arith.constant 0 : index
    %c0_32 = arith.constant 0 : index
    %56 = vector.load %arg10[%c0_31, %c0_32] : memref<128x128xf32, #tpu.memory_space<vmem>>, vector<128x128xf32>
    %cst_33 = arith.constant dense<0.000000e+00> : vector<2x128xf32>
    %57 = tpu.matmul %55, %56, %cst_33 {dimension_numbers = #tpu.dot_dimension_numbers<[1], [0], [0], [1], [0, 0, 1, 1], [], []>} : vector<2x128xf32>, vector<128x128xf32>, vector<2x128xf32> -> vector<2x128xf32>
    %c0_34 = arith.constant 0 : index
    %c0_35 = arith.constant 0 : index
    %58 = vector.load %arg11[%c0_34, %c0_35] : memref<1x128xf32, #tpu.memory_space<vmem>>, vector<1x128xf32>
    %59 = vector.broadcast %58 : vector<1x128xf32> to vector<2x128xf32>
    %60 = arith.addf %57, %59 : vector<2x128xf32>
    %61 = arith.addf %5, %60 : vector<2x128xf32>
    %cst_36 = arith.constant dense<0.000000e+00> : vector<2xf32>
    %62 = vector.multi_reduction <add>, %61, %cst_36 [1] : vector<2x128xf32> to vector<2xf32>
    %63 = vector.shape_cast %62 : vector<2xf32> to vector<2x1xf32>
    %cst_37 = arith.constant 3.125000e-02 : f32
    %64 = vector.broadcast %cst_37 : f32 to vector<2x1xf32>
    %65 = arith.mulf %63, %64 : vector<2x1xf32>
    %66 = vector.broadcast %65 : vector<2x1xf32> to vector<2x128xf32>
    %67 = arith.subf %61, %66 : vector<2x128xf32>
    %68 = tpu.iota {dimensions = array<i32: 1>} : vector<2x128xi32>
    %c32_i32 = arith.constant 32 : i32
    %69 = vector.broadcast %c32_i32 : i32 to vector<2x128xi32>
    %70 = arith.cmpi slt, %68, %69 : vector<2x128xi32>
    %cst_38 = arith.constant 0.000000e+00 : f32
    %71 = vector.broadcast %cst_38 : f32 to vector<2x128xf32>
    %72 = arith.select %70, %67, %71 : vector<2x128xi1>, vector<2x128xf32>
    %73 = arith.mulf %72, %72 : vector<2x128xf32>
    %cst_39 = arith.constant dense<0.000000e+00> : vector<2xf32>
    %74 = vector.multi_reduction <add>, %73, %cst_39 [1] : vector<2x128xf32> to vector<2xf32>
    %75 = vector.shape_cast %74 : vector<2xf32> to vector<2x1xf32>
    %cst_40 = arith.constant 3.125000e-02 : f32
    %76 = vector.broadcast %cst_40 : f32 to vector<2x1xf32>
    %77 = arith.mulf %75, %76 : vector<2x1xf32>
    %cst_41 = arith.constant 9.99999974E-6 : f32
    %78 = vector.broadcast %cst_41 : f32 to vector<2x1xf32>
    %79 = arith.addf %77, %78 : vector<2x1xf32>
    %80 = math.rsqrt %79 : vector<2x1xf32>
    %81 = vector.broadcast %80 : vector<2x1xf32> to vector<2x128xf32>
    %82 = arith.mulf %72, %81 : vector<2x128xf32>
    %c0_42 = arith.constant 0 : index
    %c0_43 = arith.constant 0 : index
    %83 = vector.load %arg12[%c0_42, %c0_43] : memref<1x128xf32, #tpu.memory_space<vmem>>, vector<1x128xf32>
    %84 = vector.broadcast %83 : vector<1x128xf32> to vector<2x128xf32>
    %85 = arith.mulf %82, %84 : vector<2x128xf32>
    %c0_44 = arith.constant 0 : index
    %c0_45 = arith.constant 0 : index
    %86 = vector.load %arg13[%c0_44, %c0_45] : memref<1x128xf32, #tpu.memory_space<vmem>>, vector<1x128xf32>
    %87 = vector.broadcast %86 : vector<1x128xf32> to vector<2x128xf32>
    %88 = arith.addf %85, %87 : vector<2x128xf32>
    %89 = vector.shape_cast %88 : vector<2x128xf32> to vector<2x1x128xf32>
    %c0_46 = arith.constant 0 : index
    %c0_47 = arith.constant 0 : index
    %c0_48 = arith.constant 0 : index
    %90 = vector.load %arg14[%c0_46, %c0_47, %c0_48] : memref<2x1x128xf32, #tpu.memory_space<vmem>>, vector<2x1x128xf32>
    tpu.vector_store %arg14[%c0_46, %c0_47, %c0_48], %89 {strides = array<i32>} : memref<2x1x128xf32, #tpu.memory_space<vmem>>, vector<2x1x128xf32>,
    return
  }
  func.func @transform_0(%arg0: i32) -> (i32, i32, i32) {
    %c0_i32 = arith.constant 0 : i32
    %c0_i32_0 = arith.constant 0 : i32
    %c0_i32_1 = arith.constant 0 : i32
    return %arg0, %c0_i32, %c0_i32_0 : i32, i32, i32
  }
  func.func @transform_1(%arg0: i32) -> (i32, i32, i32) {
    %c0_i32 = arith.constant 0 : i32
    %c0_i32_0 = arith.constant 0 : i32
    %c0_i32_1 = arith.constant 0 : i32
    return %arg0, %c0_i32, %c0_i32_0 : i32, i32, i32
  }
  func.func @transform_2(%arg0: i32) -> (i32, i32, i32) {
    %c0_i32 = arith.constant 0 : i32
    %c0_i32_0 = arith.constant 0 : i32
    %c0_i32_1 = arith.constant 0 : i32
    return %arg0, %c0_i32, %c0_i32_0 : i32, i32, i32
  }
  func.func @transform_3(%arg0: i32) -> (i32, i32) {
    %c0_i32 = arith.constant 0 : i32
    %c0_i32_0 = arith.constant 0 : i32
    %c0_i32_1 = arith.constant 0 : i32
    return %c0_i32, %c0_i32_0 : i32, i32
  }
  func.func @transform_4(%arg0: i32) -> (i32, i32) {
    %c0_i32 = arith.constant 0 : i32
    %c0_i32_0 = arith.constant 0 : i32
    %c0_i32_1 = arith.constant 0 : i32
    return %c0_i32, %c0_i32_0 : i32, i32
  }
  func.func @transform_5(%arg0: i32) -> (i32, i32) {
    %c0_i32 = arith.constant 0 : i32
    %c0_i32_0 = arith.constant 0 : i32
    %c0_i32_1 = arith.constant 0 : i32
    return %c0_i32, %c0_i32_0 : i32, i32
  }
  func.func @transform_6(%arg0: i32) -> (i32, i32) {
    %c0_i32 = arith.constant 0 : i32
    %c0_i32_0 = arith.constant 0 : i32
    %c0_i32_1 = arith.constant 0 : i32
    return %c0_i32, %c0_i32_0 : i32, i32
  }
  func.func @transform_7(%arg0: i32) -> (i32, i32) {
    %c0_i32 = arith.constant 0 : i32
    %c0_i32_0 = arith.constant 0 : i32
    %c0_i32_1 = arith.constant 0 : i32
    return %c0_i32, %c0_i32_0 : i32, i32
  }
  func.func @transform_8(%arg0: i32) -> (i32, i32) {
    %c0_i32 = arith.constant 0 : i32
    %c0_i32_0 = arith.constant 0 : i32
    %c0_i32_1 = arith.constant 0 : i32
    return %c0_i32, %c0_i32_0 : i32, i32
  }
  func.func @transform_9(%arg0: i32) -> (i32, i32) {
    %c0_i32 = arith.constant 0 : i32
    %c0_i32_0 = arith.constant 0 : i32
    %c0_i32_1 = arith.constant 0 : i32
    return %c0_i32, %c0_i32_0 : i32, i32
  }
  func.func @transform_10(%arg0: i32) -> (i32, i32) {
    %c0_i32 = arith.constant 0 : i32
    %c0_i32_0 = arith.constant 0 : i32
    %c0_i32_1 = arith.constant 0 : i32
    return %c0_i32, %c0_i32_0 : i32, i32
  }
  func.func @transform_11(%arg0: i32) -> (i32, i32) {
    %c0_i32 = arith.constant 0 : i32
    %c0_i32_0 = arith.constant 0 : i32
    %c0_i32_1 = arith.constant 0 : i32
    return %c0_i32, %c0_i32_0 : i32, i32
  }
  func.func @transform_12(%arg0: i32) -> (i32, i32) {
    %c0_i32 = arith.constant 0 : i32
    %c0_i32_0 = arith.constant 0 : i32
    %c0_i32_1 = arith.constant 0 : i32
    return %c0_i32, %c0_i32_0 : i32, i32
  }
  func.func @transform_13(%arg0: i32) -> (i32, i32, i32) {
    %c0_i32 = arith.constant 0 : i32
    %c0_i32_0 = arith.constant 0 : i32
    %c0_i32_1 = arith.constant 0 : i32
    return %arg0, %c0_i32, %c0_i32_0 : i32, i32, i32
  }
  func.func @transform_14(%arg0: i32) -> (i32, i32, i32) {
    %c0_i32 = arith.constant 0 : i32
    %c0_i32_0 = arith.constant 0 : i32
    %c0_i32_1 = arith.constant 0 : i32
    return %arg0, %c0_i32, %c0_i32_0 : i32, i32, i32
  }
}

</mosaic_0001>

<bundles_post_ra>
// kernel: tpu_custom_call.1
= control target key start
LH: loop header
LB: loop body
LE: loop exit
PB: predicated region body
PF: predicated region fallthrough
CT: control target
= control target key end

     0   :  { %20 = vsyncpa [#allocation3], 0  ;;  %s2326_s0 = inlined_call_operand.hbm [shape: f32[2,8,128], index: 0, kind: input, shape index: {}]   ;;  %s2327_s1 = inlined_call_operand.hbm [shape: f32[2,8,128], index: 1, kind: input, shape index: {}]   ;;  %s2328_s2 = inlined_call_operand.hbm [shape: f32[2,1,128], index: 2, kind: input, shape index: {}]   ;;  %s2329_s3 = inlined_call_operand.hbm [shape: f32[128,128], index: 3, kind: input, shape index: {}]   ;;  %s2330_s4 = inlined_call_operand.hbm [shape: f32[1,128], index: 4, kind: input, shape index: {}]   ;;  %s2331_s5 = inlined_call_operand.hbm [shape: f32[128,128], index: 5, kind: input, shape index: {}]   ;;  %s2332_s6 = inlined_call_operand.hbm [shape: f32[1,128], index: 6, kind: input, shape index: {}]   ;;  %s2333_s7 = inlined_call_operand.hbm [shape: f32[128,128], index: 7, kind: input, shape index: {}]   ;;  %s2334_s8 = inlined_call_operand.hbm [shape: f32[1,128], index: 8, kind: input, shape index: {}]   ;;  %s2335_s9 = inlined_call_operand.hbm [shape: f32[128,128], index: 9, kind: input, shape index: {}]   ;;  %s2336_s10 = inlined_call_operand.hbm [shape: f32[1,128], index: 10, kind: input, shape index: {}]   ;;  %s2337_s11 = inlined_call_operand.hbm [shape: f32[1,128], index: 11, kind: input, shape index: {}]   ;;  %s2338_s12 = inlined_call_operand.hbm [shape: f32[1,128], index: 12, kind: input, shape index: {}]   ;;  %s2339_s13 = inlined_call_operand.hbm [shape: f32[2,1,128], index: 13, kind: output, shape index: {0}]   ;;  %s2340_s14 = inlined_call_operand.hbm [shape: f32[2,4,8], index: 14, kind: output, shape index: {1}]  }
   0x1   :  { %21 = vsyncpa [#allocation6], 0 }
   0x2   :  { %22 = vsyncpa [#allocation9], 0 }
   0x3   :  { %23 = vsyncpa [#allocation12], 0 }
   0x4   :  { %24 = vsyncpa [#allocation15], 0 }
   0x5   :  { %25 = vsyncpa [#allocation18], 0 }
   0x6   :  { %26 = vsyncpa [#allocation21], 0 }
   0x7   :  { %27 = vsyncpa [#allocation4], 0 }
   0x8   :  { %28 = vsyncpa [#allocation25], 0  ;;  %s1915_s29 = smov [#allocation5]   ;;  %s1916_s15 = smov [#allocation8]  }
   0x9   :  { %s46_s30 = sshll.u32 %s1915_s29, 4  ;;  %s70_s16 = sshll.u32 %s1916_s15, 4  ;;  %s47_s30 = int_to_ptr.vmem [resolvable:$true] %s46_s30  ;;  %s2015_s16 = int_to_ptr.vmem [resolvable:$true] %s70_s16 }
   0xa   :  { %s1567_s19 = scalar_lea.hbm %s2327_s1, 256 }
   0xb   :  { %p1568_p0 = scmp.ne.s32.totalorder %s2327_s1, %s1567_s19  ;;  %p1571_p1 = scmp.lt.u32.totalorder %s1567_s19, %s2327_s1 }
   0xd   :  { %p1573_p2 = pnand %p1571_p1, %p1568_p0 }
   0xf   :  { %1576 = shalt.err (!%p1573_p2)
}
  0x10   :  { %s1577_s24 = scalar_lea.vmem %s47_s30, 256  ;;  %p1582_p4 = scmp.lt.s32.totalorder %s47_s30, %s47_s30 }
  0x11   :  { %p1578_p3 = scmp.ne.s32.totalorder %s47_s30, %s1577_s24  ;;  %p1583_p5 = scmp.lt.s32.totalorder %s1577_s24, %s1577_s24 }
  0x13   :  { %p1584_p6 = por %p1583_p5, %p1582_p4 }
  0x15   :  { %p1585_p7 = pnand %p1584_p6, %p1578_p3 }
  0x17   :  { %1588 = shalt.err (!%p1585_p7)
}
  0x18   :  { %s1917_s25 = smov 128   ;;  %s1918_s26 = smov 8  }
  0x19   :  { %52 = dma.hbm_to_vmem [thread:$0]  %s2327_s1, 256, %s47_s30, [#allocation6], %s1917_s25, %s1917_s25, %s1918_s26  }
  0x1a   :  { %s1589_s17 = scalar_lea.hbm %s2329_s3, 2048 }
  0x1b   :  { %p1590_p8 = scmp.ne.s32.totalorder %s2329_s3, %s1589_s17  ;;  %p1593_p9 = scmp.lt.u32.totalorder %s1589_s17, %s2329_s3 }
  0x1d   :  { %p1595_p10 = pnand %p1593_p9, %p1590_p8 }
  0x1f   :  { %1598 = shalt.err (!%p1595_p10)
}
  0x20   :  { %s1599_s22 = scalar_lea.vmem %s2015_s16, 2048  ;;  %p1604_p12 = scmp.lt.s32.totalorder %s2015_s16, %s2015_s16 }
  0x21   :  { %p1600_p11 = scmp.ne.s32.totalorder %s2015_s16, %s1599_s22  ;;  %p1605_p13 = scmp.lt.s32.totalorder %s1599_s22, %s1599_s22 }
  0x23   :  { %p1606_p0 = por %p1605_p13, %p1604_p12 }
  0x25   :  { %p1607_p1 = pnand %p1606_p0, %p1600_p11 }
  0x27   :  { %1610 = shalt.err (!%p1607_p1)
}
  0x28   :  { %76 = dma.hbm_to_vmem [thread:$0]  %s2329_s3, 2048, %s2015_s16, [#allocation9], %s1917_s25, %s1917_s25, %s1918_s26  }
  0x29   :  { %s1919_s23 = smov [#allocation11]   ;;  %s1920_s27 = smov [#allocation14]  }
  0x2a   :  { %s92_s24 = sshll.u32 %s1919_s23, 4  ;;  %s114_s28 = sshll.u32 %s1920_s27, 4  ;;  %s93_s24 = int_to_ptr.vmem [resolvable:$true] %s92_s24  ;;  %s2052_s28 = int_to_ptr.vmem [resolvable:$true] %s114_s28 }
  0x2b   :  { %s1611_s17 = scalar_lea.hbm %s2331_s5, 2048 }
  0x2c   :  { %p1612_p2 = scmp.ne.s32.totalorder %s2331_s5, %s1611_s17  ;;  %p1615_p3 = scmp.lt.u32.totalorder %s1611_s17, %s2331_s5 }
  0x2e   :  { %p1617_p4 = pnand %p1615_p3, %p1612_p2 }
  0x30   :  { %1620 = shalt.err (!%p1617_p4)
}
  0x31   :  { %s1621_s3 = scalar_lea.vmem %s93_s24, 2048  ;;  %p1626_p6 = scmp.lt.s32.totalorder %s93_s24, %s93_s24 }
  0x32   :  { %p1622_p5 = scmp.ne.s32.totalorder %s93_s24, %s1621_s3  ;;  %p1627_p7 = scmp.lt.s32.totalorder %s1621_s3, %s1621_s3 }
  0x34   :  { %p1628_p8 = por %p1627_p7, %p1626_p6 }
  0x36   :  { %p1629_p9 = pnand %p1628_p8, %p1622_p5 }
  0x38   :  { %1632 = shalt.err (!%p1629_p9)
}
  0x39   :  { %98 = dma.hbm_to_vmem [thread:$0]  %s2331_s5, 2048, %s93_s24, [#allocation12], %s1917_s25, %s1917_s25, %s1918_s26  }
  0x3a   :  { %s1633_s23 = scalar_lea.hbm %s2333_s7, 2048 }
  0x3b   :  { %p1634_p10 = scmp.ne.s32.totalorder %s2333_s7, %s1633_s23  ;;  %p1637_p11 = scmp.lt.u32.totalorder %s1633_s23, %s2333_s7 }
  0x3d   :  { %p1639_p12 = pnand %p1637_p11, %p1634_p10 }
  0x3f   :  { %1642 = shalt.err (!%p1639_p12)
}
  0x40   :  { %s1643_s18 = scalar_lea.vmem %s2052_s28, 2048  ;;  %p1648_p0 = scmp.lt.s32.totalorder %s2052_s28, %s2052_s28 }
  0x41   :  { %p1644_p13 = scmp.ne.s32.totalorder %s2052_s28, %s1643_s18  ;;  %p1649_p1 = scmp.lt.s32.totalorder %s1643_s18, %s1643_s18 }
  0x43   :  { %p1650_p2 = por %p1649_p1, %p1648_p0 }
  0x45   :  { %p1651_p3 = pnand %p1650_p2, %p1644_p13 }
  0x47   :  { %1654 = shalt.err (!%p1651_p3)
}
  0x48   :  { %120 = dma.hbm_to_vmem [thread:$0]  %s2333_s7, 2048, %s2052_s28, [#allocation15], %s1917_s25, %s1917_s25, %s1918_s26  }
  0x49   :  { %s1921_s19 = smov [#allocation17]   ;;  %s1922_s21 = smov [#allocation20]  }
  0x4a   :  { %s136_s20 = sshll.u32 %s1921_s19, 4  ;;  %s159_s3 = sshll.u32 %s1922_s21, 4  ;;  %s137_s20 = int_to_ptr.vmem [resolvable:$true] %s136_s20  ;;  %s160_s3 = int_to_ptr.vmem [resolvable:$true] %s159_s3 }
  0x4b   :  { %s1655_s1 = scalar_lea.hbm %s2335_s9, 2048 }
  0x4c   :  { %p1656_p4 = scmp.ne.s32.totalorder %s2335_s9, %s1655_s1  ;;  %p1659_p5 = scmp.lt.u32.totalorder %s1655_s1, %s2335_s9 }
  0x4e   :  { %p1661_p6 = pnand %p1659_p5, %p1656_p4 }
  0x50   :  { %1664 = shalt.err (!%p1661_p6)
}
  0x51   :  { %s1665_s7 = scalar_lea.vmem %s137_s20, 2048  ;;  %p1670_p8 = scmp.lt.s32.totalorder %s137_s20, %s137_s20 }
  0x52   :  { %p1666_p7 = scmp.ne.s32.totalorder %s137_s20, %s1665_s7  ;;  %p1671_p9 = scmp.lt.s32.totalorder %s1665_s7, %s1665_s7 }
  0x54   :  { %p1672_p10 = por %p1671_p9, %p1670_p8 }
  0x56   :  { %p1673_p11 = pnand %p1672_p10, %p1666_p7 }
  0x58   :  { %1676 = shalt.err (!%p1673_p11)
}
  0x59   :  { %142 = dma.hbm_to_vmem [thread:$0]  %s2335_s9, 2048, %s137_s20, [#allocation18], %s1917_s25, %s1917_s25, %s1918_s26  }
  0x5a   :  { %s1677_s5 = scalar_lea.hbm %s2337_s11, 16 }
  0x5b   :  { %p1678_p12 = scmp.ne.s32.totalorder %s2337_s11, %s1677_s5  ;;  %p1681_p13 = scmp.lt.u32.totalorder %s1677_s5, %s2337_s11 }
  0x5d   :  { %p1683_p0 = pnand %p1681_p13, %p1678_p12 }
  0x5f   :  { %1686 = shalt.err (!%p1683_p0)
}
  0x60   :  { %s1687_s22 = scalar_lea.vmem %s160_s3, 16  ;;  %s1691_s1 = scalar_lea.vmem %s160_s3, 32 }
  0x61   :  { %p1688_p1 = scmp.ne.s32.totalorder %s160_s3, %s1687_s22  ;;  %p1692_p2 = scmp.lt.s32.totalorder %s160_s3, %s160_s3 }
  0x62   :  { %p1693_p3 = scmp.lt.s32.totalorder %s1691_s1, %s1687_s22 }
  0x64   :  { %p1694_p4 = por %p1693_p3, %p1692_p2 }
  0x66   :  { %p1695_p5 = pnand %p1694_p4, %p1688_p1 }
  0x68   :  { %1698 = shalt.err (!%p1695_p5)
}
  0x69   :  { %162 = dma.hbm_to_vmem [thread:$0]  %s2337_s11, 16, %s160_s3, [#allocation21]  }
  0x6a   :  { %s1923_s30 = smov [#allocation2]   ;;  %s1924_s27 = smov [#allocation7]  }
  0x6b   :  { %s34_s23 = sshll.u32 %s1923_s30, 4  ;;  %s58_s29 = sshll.u32 %s1924_s27, 4  ;;  %s35_s23 = int_to_ptr.vmem [resolvable:$true] %s34_s23  ;;  %s2116_s29 = int_to_ptr.vmem [resolvable:$true] %s58_s29 }
  0x6c   :  { %s1699_s15 = scalar_lea.hbm %s2326_s0, 256 }
  0x6d   :  { %p1700_p6 = scmp.ne.s32.totalorder %s2326_s0, %s1699_s15  ;;  %p1703_p7 = scmp.lt.u32.totalorder %s1699_s15, %s2326_s0 }
  0x6f   :  { %p1705_p8 = pnand %p1703_p7, %p1700_p6 }
  0x71   :  { %1708 = shalt.err (!%p1705_p8)
}
  0x72   :  { %s1709_s11 = scalar_lea.vmem %s35_s23, 256  ;;  %p1714_p10 = scmp.lt.s32.totalorder %s35_s23, %s35_s23 }
  0x73   :  { %p1710_p9 = scmp.ne.s32.totalorder %s35_s23, %s1709_s11  ;;  %p1715_p11 = scmp.lt.s32.totalorder %s1709_s11, %s1709_s11 }
  0x75   :  { %p1716_p12 = por %p1715_p11, %p1714_p10 }
  0x77   :  { %p1717_p13 = pnand %p1716_p12, %p1710_p9 }
  0x79   :  { %1720 = shalt.err (!%p1717_p13)
}
  0x7a   :  { %40 = dma.hbm_to_vmem [thread:$0]  %s2326_s0, 256, %s35_s23, [#allocation3], %s1917_s25, %s1917_s25, %s1918_s26  }
  0x7b   :  { %s1721_s22 = scalar_lea.hbm %s2328_s2, 32 }
  0x7c   :  { %p1722_p0 = scmp.ne.s32.totalorder %s2328_s2, %s1721_s22  ;;  %p1725_p1 = scmp.lt.u32.totalorder %s1721_s22, %s2328_s2 }
  0x7e   :  { %p1727_p2 = pnand %p1725_p1, %p1722_p0 }
  0x80   :  { %1730 = shalt.err (!%p1727_p2)
}
  0x81   :  { %s1731_s27 = scalar_lea.vmem %s2116_s29, 32  ;;  %p1736_p4 = scmp.lt.s32.totalorder %s2116_s29, %s2116_s29 }
  0x82   :  { %p1732_p3 = scmp.ne.s32.totalorder %s2116_s29, %s1731_s27  ;;  %p1737_p5 = scmp.lt.s32.totalorder %s1731_s27, %s1731_s27 }
  0x84   :  { %p1738_p6 = por %p1737_p5, %p1736_p4 }
  0x86   :  { %p1739_p7 = pnand %p1738_p6, %p1732_p3 }
  0x88   :  { %1742 = shalt.err (!%p1739_p7)
}
  0x89   :  { %s1925_s0 = smov 16   ;;  %s1926_s25 = smov 1  }
  0x8a   :  { %64 = dma.hbm_to_vmem [thread:$0]  %s2328_s2, 32, %s2116_s29, [#allocation6], %s1925_s0, %s1925_s0, %s1926_s25  }
  0x8b   :  { %s1927_s7 = smov [#allocation10]   ;;  %s1928_s15 = smov [#allocation13]  }
  0x8c   :  { %s83_s28 = sshll.u32 %s1927_s7, 4  ;;  %s105_s17 = sshll.u32 %s1928_s15, 4  ;;  %s84_s28 = int_to_ptr.vmem [resolvable:$true] %s83_s28  ;;  %s106_s17 = int_to_ptr.vmem [resolvable:$true] %s105_s17 }
  0x8d   :  { %s1743_s24 = scalar_lea.hbm %s2330_s4, 16 }
  0x8e   :  { %p1744_p8 = scmp.ne.s32.totalorder %s2330_s4, %s1743_s24  ;;  %p1747_p9 = scmp.lt.u32.totalorder %s1743_s24, %s2330_s4 }
  0x90   :  { %p1749_p10 = pnand %p1747_p9, %p1744_p8 }
  0x92   :  { %1752 = shalt.err (!%p1749_p10)
}
  0x93   :  { %s1753_s2 = scalar_lea.vmem %s84_s28, 16  ;;  %s1757_s29 = scalar_lea.vmem %s84_s28, 32 }
  0x94   :  { %p1754_p11 = scmp.ne.s32.totalorder %s84_s28, %s1753_s2  ;;  %p1758_p12 = scmp.lt.s32.totalorder %s84_s28, %s84_s28 }
  0x95   :  { %p1759_p13 = scmp.lt.s32.totalorder %s1757_s29, %s1753_s2 }
  0x97   :  { %p1760_p0 = por %p1759_p13, %p1758_p12 }
  0x99   :  { %p1761_p1 = pnand %p1760_p0, %p1754_p11 }
  0x9b   :  { %1764 = shalt.err (!%p1761_p1)
}
  0x9c   :  { %86 = dma.hbm_to_vmem [thread:$0]  %s2330_s4, 16, %s84_s28, [#allocation9]  }
  0x9d   :  { %s1765_s20 = scalar_lea.hbm %s2332_s6, 16 }
  0x9e   :  { %p1766_p2 = scmp.ne.s32.totalorder %s2332_s6, %s1765_s20  ;;  %p1769_p3 = scmp.lt.u32.totalorder %s1765_s20, %s2332_s6 }
  0xa0   :  { %p1771_p4 = pnand %p1769_p3, %p1766_p2 }
  0xa2   :  { %1774 = shalt.err (!%p1771_p4)
}
  0xa3   :  { %s1775_s7 = scalar_lea.vmem %s106_s17, 16  ;;  %s1779_s15 = scalar_lea.vmem %s106_s17, 32 }
  0xa4   :  { %p1776_p5 = scmp.ne.s32.totalorder %s106_s17, %s1775_s7  ;;  %p1780_p6 = scmp.lt.s32.totalorder %s106_s17, %s106_s17 }
  0xa5   :  { %p1781_p7 = scmp.lt.s32.totalorder %s1779_s15, %s1775_s7 }
  0xa7   :  { %p1782_p8 = por %p1781_p7, %p1780_p6 }
  0xa9   :  { %p1783_p9 = pnand %p1782_p8, %p1776_p5 }
  0xab   :  { %1786 = shalt.err (!%p1783_p9)
}
  0xac   :  { %108 = dma.hbm_to_vmem [thread:$0]  %s2332_s6, 16, %s106_s17, [#allocation12]  }
  0xad   :  { %s1929_s18 = smov [#allocation16]   ;;  %s1930_s24 = smov [#allocation19]  }
  0xae   :  { %s127_s5 = sshll.u32 %s1929_s18, 4  ;;  %s149_s11 = sshll.u32 %s1930_s24, 4  ;;  %s128_s5 = int_to_ptr.vmem [resolvable:$true] %s127_s5  ;;  %s150_s11 = int_to_ptr.vmem [resolvable:$true] %s149_s11 }
  0xaf   :  { %s1787_s21 = scalar_lea.hbm %s2334_s8, 16 }
  0xb0   :  { %p1788_p10 = scmp.ne.s32.totalorder %s2334_s8, %s1787_s21  ;;  %p1791_p11 = scmp.lt.u32.totalorder %s1787_s21, %s2334_s8 }
  0xb2   :  { %p1793_p12 = pnand %p1791_p11, %p1788_p10 }
  0xb4   :  { %1796 = shalt.err (!%p1793_p12)
}
  0xb5   :  { %s1797_s6 = scalar_lea.vmem %s128_s5, 16  ;;  %s1801_s17 = scalar_lea.vmem %s128_s5, 32 }
  0xb6   :  { %p1798_p13 = scmp.ne.s32.totalorder %s128_s5, %s1797_s6  ;;  %p1802_p0 = scmp.lt.s32.totalorder %s128_s5, %s128_s5 }
  0xb7   :  { %p1803_p1 = scmp.lt.s32.totalorder %s1801_s17, %s1797_s6 }
  0xb9   :  { %p1804_p2 = por %p1803_p1, %p1802_p0 }
  0xbb   :  { %p1805_p3 = pnand %p1804_p2, %p1798_p13 }
  0xbd   :  { %1808 = shalt.err (!%p1805_p3)
}
  0xbe   :  { %130 = dma.hbm_to_vmem [thread:$0]  %s2334_s8, 16, %s128_s5, [#allocation15]  }
  0xbf   :  { %s1809_s27 = scalar_lea.hbm %s2336_s10, 16 }
  0xc0   :  { %p1810_p4 = scmp.ne.s32.totalorder %s2336_s10, %s1809_s27  ;;  %p1813_p5 = scmp.lt.u32.totalorder %s1809_s27, %s2336_s10 }
  0xc2   :  { %p1815_p6 = pnand %p1813_p5, %p1810_p4 }
  0xc4   :  { %1818 = shalt.err (!%p1815_p6)
}
  0xc5   :  { %s1819_s4 = scalar_lea.vmem %s150_s11, 16  ;;  %s1823_s28 = scalar_lea.vmem %s150_s11, 32 }
  0xc6   :  { %p1820_p7 = scmp.ne.s32.totalorder %s150_s11, %s1819_s4  ;;  %p1824_p8 = scmp.lt.s32.totalorder %s150_s11, %s150_s11 }
  0xc7   :  { %p1825_p9 = scmp.lt.s32.totalorder %s1823_s28, %s1819_s4 }
  0xc9   :  { %p1826_p10 = por %p1825_p9, %p1824_p8 }
  0xcb   :  { %p1827_p11 = pnand %p1826_p10, %p1820_p7 }
  0xcd   :  { %1830 = shalt.err (!%p1827_p11)
}
  0xce   :  { %152 = dma.hbm_to_vmem [thread:$0]  %s2336_s10, 16, %s150_s11, [#allocation18]  }
  0xcf   :  { %s1931_s5 = smov [#allocation22]   ;;  %s1831_s21 = scalar_lea.hbm %s2338_s12, 16 }
  0xd0   :  { %s169_s24 = sshll.u32 %s1931_s5, 4  ;;  %p1832_p12 = scmp.ne.s32.totalorder %s2338_s12, %s1831_s21  ;;  %s170_s24 = int_to_ptr.vmem [resolvable:$true] %s169_s24 }
  0xd1   :  { %p1835_p13 = scmp.lt.u32.totalorder %s1831_s21, %s2338_s12 }
  0xd3   :  { %p1837_p0 = pnand %p1835_p13, %p1832_p12 }
  0xd5   :  { %1840 = shalt.err (!%p1837_p0)
}
  0xd6   :  { %s1841_s6 = scalar_lea.vmem %s170_s24, 16  ;;  %s1845_s10 = scalar_lea.vmem %s170_s24, 32 }
  0xd7   :  { %p1842_p1 = scmp.ne.s32.totalorder %s170_s24, %s1841_s6  ;;  %p1846_p2 = scmp.lt.s32.totalorder %s170_s24, %s170_s24 }
  0xd8   :  { %p1847_p3 = scmp.lt.s32.totalorder %s1845_s10, %s1841_s6 }
  0xda   :  { %p1848_p4 = por %p1847_p3, %p1846_p2 }
  0xdc   :  { %p1849_p5 = pnand %p1848_p4, %p1842_p1 }
  0xde   :  { %1852 = shalt.err (!%p1849_p5)
}
  0xdf   :  { %172 = dma.hbm_to_vmem [thread:$0]  %s2338_s12, 16, %s170_s24, [#allocation21]  }
  0xe0   :  { %1897 = dma.done.wait [#allocation3], 256  }
  0xe1   :  { %1898 = vsyncadd [#allocation3], 4294967040 }
  0xe2   :  { %1899 = dma.done.wait [#allocation6], 288  }
  0xe3   :  { %1900 = vsyncadd [#allocation6], 4294967008 }
  0xe4   :  { %1901 = dma.done.wait [#allocation9], 2064  }
  0xe5   :  { %1902 = vsyncadd [#allocation9], 4294965232 }
  0xe6   :  { %1903 = dma.done.wait [#allocation12], 2064  }
  0xe7   :  { %1904 = vsyncadd [#allocation12], 4294965232 }
  0xe8   :  { %1905 = dma.done.wait [#allocation15], 2064  }
  0xe9   :  { %1906 = vsyncadd [#allocation15], 4294965232 }
  0xea   :  { %1907 = dma.done.wait [#allocation18], 2064  }
  0xeb   :  { %1908 = vsyncadd [#allocation18], 4294965232 }
  0xec   :  { %1909 = dma.done.wait [#allocation21], 32  }
  0xed   :  { %1910 = vsyncadd [#allocation21], 4294967264  ;;  %v218_v0 = vld [vmem:[#allocation8] sm:$0xff]  ;;  %v219_v1 = vld [vmem:[#allocation8 + $0x8] sm:$0xff]  ;;  %v1932_v29 = vmov 0.0|0.0   ;;  %vm1933_vm0 = vmmov 0   ;;  %v443_v44 = vlaneseq }
  0xee   :  { %v220_v2 = vld [vmem:[#allocation8 + $0x10] sm:$0xff]  ;;  %v1420_v3 = vpack.c.bf16 %v219_v1, %v218_v0  ;;  %v221_v4 = vld [vmem:[#allocation8 + $0x18] sm:$0xff]  ;;  %v222_v6 = vld [vmem:[#allocation8 + $0x20] sm:$0xff]  ;;  %v1934_v33 = vmov 0.0   ;;  %v1935_v42 = vmov 1966171168  }
  0xef   :  { %v1424_v5 = vpack.c.bf16 %v221_v4, %v220_v2  ;;  %v223_v7 = vld [vmem:[#allocation8 + $0x28] sm:$0xff]  ;;  %v212_v9 = vld [vmem:[#allocation2] sm:$0xff]  ;;  %v224_v10 = vld [vmem:[#allocation8 + $0x30] sm:$0xff]  ;;  %v441_v43 = vunpack.c.l.s4 %v1935_v42  ;;  %v2220_v49 = vshrl.u32 %v443_v44, 7  ;;  %v2241_v4 = vand.u32 127, %v443_v44  ;;  %s1936_s12 = smov [#allocation24]  }
  0xf0   :  { %1421 = vmatprep.subr.bf16.mxu0 %v1420_v3  ;;  %v1428_v8 = vpack.c.bf16 %v223_v7, %v222_v6  ;;  %v225_v11 = vld [vmem:[#allocation8 + $0x38] sm:$0xff]  ;;  %1292 = vmatprep.mubr.f32.mxu0 %v212_v9  ;;  %v226_v13 = vld [vmem:[#allocation8 + $0x40] sm:$0xff]  ;;  %v227_v14 = vld [vmem:[#allocation8 + $0x48] sm:$0xff]  ;;  %vm711_vm4 = vcmask 60416   ;;  %vm736_vm5 = vcmask 64512   ;;  %vm885_vm6 = vcmask 1043456  }
  0xf1   :  { %1423 = vmatpush3.bf16.msra.mxu0 %v1420_v3  ;;  %v1432_v12 = vpack.c.bf16 %v225_v11, %v224_v10  ;;  %v1436_v15 = vpack.c.bf16 %v227_v14, %v226_v13  ;;  %v228_v16 = vld [vmem:[#allocation8 + $0x50] sm:$0xff]  ;;  %v229_v17 = vld [vmem:[#allocation8 + $0x58] sm:$0xff]  ;;  %v230_v19 = vld [vmem:[#allocation8 + $0x60] sm:$0xff]  ;;  %v442_v48 = vunpack.c.0.s8 %v441_v43  ;;  %v529_v3 = vmul.u32 8, %v2220_v49  ;;  %s1149_s1 = sshll.u32 %s1936_s12, 4  ;;  %s1150_s1 = int_to_ptr.vmem [resolvable:$true] %s1149_s1 }
  0xf2   :  { %1425 = vmatprep.subr.bf16.mxu0 %v1424_v5  ;;  %v1440_v18 = vpack.c.bf16 %v229_v17, %v228_v16  ;;  %v231_v20 = vld [vmem:[#allocation8 + $0x68] sm:$0xff]  ;;  %v232_v22 = vld [vmem:[#allocation8 + $0x70] sm:$0xff]  ;;  %v233_v23 = vld [vmem:[#allocation8 + $0x78] sm:$0xff]  ;;  %v2247_v11 = vsub.s32 0, %v2220_v49  ;;  %vm925_vm7 = vcmask 1041409   ;;  %vm1043_vm8 = vcmask 1041408   ;;  %p1858_p7 = scmp.lt.s32.totalorder %s1150_s1, %s1150_s1 }
  0xf3   :  { %v1444_v21 = vpack.c.bf16 %v231_v20, %v230_v19  ;;  %v1448_v24 = vpack.c.bf16 %v233_v23, %v232_v22  ;;  %v414_v25 = vld [vmem:[#allocation14] sm:$0xff]  ;;  %v415_v26 = vld [vmem:[#allocation14 + $0x8] sm:$0xff]  ;;  %v416_v30 = vld [vmem:[#allocation14 + $0x10] sm:$0xff]  ;;  %v2230_v56 = vsub.s32 %v442_v48, %v2220_v49  ;;  %vm530_vm1 = vcmp.ge.s32.totalorder %v2241_v4, %v529_v3  ;;  %s1853_s9 = scalar_lea.vmem %s1150_s1, 128 }
  0xf4   :  { %v213_v27 = vld [vmem:[#allocation2 + $0x8] sm:$0xff]  ;;  %v1485_v28 = vpack.c.bf16 %v415_v26, %v414_v25  ;;  %v417_v31 = vld [vmem:[#allocation14 + $0x18] sm:$0xff]  ;;  %v420_v37 = vld [vmem:[#allocation14 + $0x30] sm:$0xff]  ;;  %vm1061_vm9 = vcmp.lt.s32.totalorder %v2241_v4, 32  ;;  %p1854_p6 = scmp.ne.s32.totalorder %s1150_s1, %s1853_s9  ;;  %p1859_p8 = scmp.lt.s32.totalorder %s1853_s9, %s1853_s9 }
  0xf5   :  { %1427 = vmatpush3.bf16.msra.mxu0 %v1424_v5  ;;  %v1488_v32 = vpack.c.bf16 %v417_v31, %v416_v30  ;;  %v418_v34 = vld [vmem:[#allocation14 + $0x20] sm:$0xff]  ;;  %v419_v35 = vld [vmem:[#allocation14 + $0x28] sm:$0xff]  ;;  %v421_v38 = vld [vmem:[#allocation14 + $0x38] sm:$0xff]  ;;  %v531_v5 = vadd.s32 8, %v529_v3 }
  0xf6   :  { %1429 = vmatprep.subr.bf16.mxu0 %v1428_v8  ;;  %v1491_v36 = vpack.c.bf16 %v419_v35, %v418_v34  ;;  %v1494_v39 = vpack.c.bf16 %v421_v38, %v420_v37  ;;  %v422_v40 = vld [vmem:[#allocation14 + $0x40] sm:$0xff]  ;;  %v423_v41 = vld [vmem:[#allocation14 + $0x48] sm:$0xff]  ;;  %v424_v46 = vld [vmem:[#allocation14 + $0x50] sm:$0xff]  ;;  %p1860_p9 = por %p1859_p8, %p1858_p7 }
  0xf7   :  { %v1497_v45 = vpack.c.bf16 %v423_v41, %v422_v40  ;;  %v425_v47 = vld [vmem:[#allocation14 + $0x58] sm:$0xff]  ;;  %v426_v53 = vld [vmem:[#allocation14 + $0x60] sm:$0xff]  ;;  %v427_v54 = vld [vmem:[#allocation14 + $0x68] sm:$0xff]  ;;  %vm532_vm2 = vcmp.lt.s32.totalorder %v2241_v4, %v531_v5 }
  0xf8   :  { %v1500_v50 = vpack.c.bf16 %v425_v47, %v424_v46  ;;  %v2222_v51 = vld [vmem:[#allocation7] sm:$0x1]  ;;  %v2224_v52 = vld [vmem:[#allocation7 + $0x1] sm:$0x1]  ;;  %v1503_v57 = vpack.c.bf16 %v427_v54, %v426_v53  ;;  %v428_v58 = vld [vmem:[#allocation14 + $0x70] sm:$0xff]  ;;  %p1861_p10 = pnand %p1860_p9, %p1854_p6 }
  0xf9   :  { %1431 = vmatpush3.bf16.msra.mxu0 %v1428_v8  ;;  %v439_v55 = vcombine.low %v2222_v51, %v2224_v52  ;;  %v429_v59 = vld [vmem:[#allocation14 + $0x78] sm:$0xff]  ;;  %v1173_v6 = vld [vmem:[#allocation16] ss:$0 sm:$0xff]  ;;  %vm533_vm3 = vmand %vm530_vm1, %vm532_vm2 }
  0xfa   :  { %1433 = vmatprep.subr.bf16.mxu0 %v1432_v12  ;;  %v1506_v61 = vpack.c.bf16 %v429_v59, %v428_v58  ;;  %v1171_v63 = vld [vmem:[#allocation10] ss:$0 sm:$0xff]  ;;  %v2251_v14 = vsel %vm533_vm3, 1.0, %v1934_v33  ;;  %v317_v22 = vld [vmem:[#allocation11 + $0x8] sm:$0xff]  ;;  %v318_v23 = vld [vmem:[#allocation11 + $0x10] sm:$0xff] }
  0xfb   :  { %v446_v60 = vrot.slane %v439_v55, %v2230_v56  ;;  %v319_v25 = vld [vmem:[#allocation11 + $0x18] sm:$0xff]  ;;  %v214_v31 = vld [vmem:[#allocation5] sm:$0xff]  ;;  %v328_v42 = vld [vmem:[#allocation11 + $0x60] sm:$0xff] }
  0xfc   :  { %v1456_v26 = vpack.c.bf16 %v319_v25, %v318_v23  ;;  %v323_v34 = vld [vmem:[#allocation11 + $0x38] sm:$0xff]  ;;  %1327 = vmatprep.mubr.f32.mxu1 %v214_v31  ;;  %v325_v37 = vld [vmem:[#allocation11 + $0x48] sm:$0xff] }
  0xfd   :  { %1435 = vmatpush3.bf16.msra.mxu0 %v1432_v12  ;;  %v453_v62 = vrot.slane %v446_v60, %v2230_v56  ;;  %v327_v40 = vld [vmem:[#allocation11 + $0x58] sm:$0xff]  ;;  %v329_v43 = vld [vmem:[#allocation11 + $0x68] sm:$0xff] }
  0xfe   :  { %1437 = vmatprep.subr.bf16.mxu0 %v1436_v15  ;;  %v1476_v44 = vpack.c.bf16 %v329_v43, %v328_v42  ;;  %v331_v46 = vld [vmem:[#allocation11 + $0x78] sm:$0xff]  ;;  %v904_v25 = vld [vmem:[#allocation17 + $0x20] sm:$0xff] }
  0xff   :  { %v215_v48 = vld [vmem:[#allocation5 + $0x8] sm:$0xff]  ;;  %v903_v23 = vld [vmem:[#allocation17 + $0x18] sm:$0xff] }
 0x100   :  { %v915_v42 = vld [vmem:[#allocation17 + $0x78] sm:$0xff] }
 0x101   :  { %1439 = vmatpush3.bf16.msra.mxu0 %v1436_v15 }
 0x102   :  { %1441 = vmatprep.subr.bf16.mxu0 %v1440_v18 }
 0x105   :  { %1443 = vmatpush3.bf16.msra.mxu0 %v1440_v18 }
 0x106   :  { %1445 = vmatprep.subr.bf16.mxu0 %v1444_v21 }
 0x109   :  { %1447 = vmatpush3.bf16.msra.mxu0 %v1444_v21  ;;  %v316_v21 = vld [vmem:[#allocation11] sm:$0xff] }
 0x10a   :  { %1449 = vmatprep.subr.bf16.mxu0 %v1448_v24 }
 0x10d   :  { %1451 = vmatpush3.bf16.msra.mxu0 %v1448_v24  ;;  %v1452_v24 = vpack.c.bf16 %v317_v22, %v316_v21  ;;  %v902_v22 = vld [vmem:[#allocation17 + $0x10] sm:$0xff] }
 0x10e   :  { %1484 = vmatprep.subr.bf16.mxu0 %v1932_v29 }
 0x10f   :  { %1453 = vmatprep.subr.bf16.mxu1 %v1452_v24 }
 0x110   :  { %1293 = vmatmul.mubr.f32.vlgmr.msra.gmra.mrb[0].mxu0 %v213_v27  ;;  %v320_v27 = vld [vmem:[#allocation11 + $0x20] sm:$0xff]  ;;  %1455 = vmatpush3.bf16.msra.mxu1 %v1452_v24  ;;  %v1512_v24 = vpack.c.bf16 %v903_v23, %v902_v22 }
 0x111   :  { %1486 = vmatpush3.bf16.msra.mxu0 %v1485_v28  ;;  %1362 = vmatprep.mubr.msk.f32.mxu0 %vm1933_vm0, %v1934_v33  ;;  %v321_v28 = vld [vmem:[#allocation11 + $0x28] sm:$0xff] }
 0x112   :  { %1487 = vmatprep.subr.bf16.mxu0 %v1932_v29  ;;  %1457 = vmatprep.subr.bf16.mxu1 %v1456_v26  ;;  %v1460_v30 = vpack.c.bf16 %v321_v28, %v320_v27  ;;  %v906_v28 = vld [vmem:[#allocation17 + $0x30] sm:$0xff] }
 0x114   :  { %1459 = vmatpush3.bf16.msra.mxu1 %v1456_v26  ;;  %v905_v26 = vld [vmem:[#allocation17 + $0x28] sm:$0xff] }
 0x115   :  { %1489 = vmatpush3.bf16.msra.mxu0 %v1488_v32  ;;  %v322_v32 = vld [vmem:[#allocation11 + $0x30] sm:$0xff]  ;;  %1461 = vmatprep.subr.bf16.mxu1 %v1460_v30  ;;  %v1515_v27 = vpack.c.bf16 %v905_v26, %v904_v25 }
 0x116   :  { %1490 = vmatprep.subr.bf16.mxu0 %v1932_v29  ;;  %v1464_v35 = vpack.c.bf16 %v323_v34, %v322_v32  ;;  %v908_v32 = vld [vmem:[#allocation17 + $0x40] sm:$0xff]  ;;  %v909_v34 = vld [vmem:[#allocation17 + $0x48] sm:$0xff] }
 0x118   :  { %1463 = vmatpush3.bf16.msra.mxu1 %v1460_v30  ;;  %v907_v30 = vld [vmem:[#allocation17 + $0x38] sm:$0xff] }
 0x119   :  { %1492 = vmatpush3.bf16.msra.mxu0 %v1491_v36  ;;  %v324_v36 = vld [vmem:[#allocation11 + $0x40] sm:$0xff]  ;;  %1465 = vmatprep.subr.bf16.mxu1 %v1464_v35  ;;  %v1518_v31 = vpack.c.bf16 %v907_v30, %v906_v28 }
 0x11a   :  { %1493 = vmatprep.subr.bf16.mxu0 %v1932_v29  ;;  %v1468_v38 = vpack.c.bf16 %v325_v37, %v324_v36  ;;  %v911_v36 = vld [vmem:[#allocation17 + $0x58] sm:$0xff] }
 0x11c   :  { %1467 = vmatpush3.bf16.msra.mxu1 %v1464_v35  ;;  %v910_v35 = vld [vmem:[#allocation17 + $0x50] sm:$0xff] }
 0x11d   :  { %1495 = vmatpush3.bf16.msra.mxu0 %v1494_v39  ;;  %v326_v39 = vld [vmem:[#allocation11 + $0x50] sm:$0xff]  ;;  %1469 = vmatprep.subr.bf16.mxu1 %v1468_v38  ;;  %v1524_v37 = vpack.c.bf16 %v911_v36, %v910_v35 }
 0x11e   :  { %1496 = vmatprep.subr.bf16.mxu0 %v1932_v29  ;;  %v1472_v41 = vpack.c.bf16 %v327_v40, %v326_v39  ;;  %v913_v39 = vld [vmem:[#allocation17 + $0x68] sm:$0xff] }
 0x120   :  { %1471 = vmatpush3.bf16.msra.mxu1 %v1468_v38  ;;  %v912_v38 = vld [vmem:[#allocation17 + $0x60] sm:$0xff] }
 0x121   :  { %1498 = vmatpush3.bf16.msra.mxu0 %v1497_v45  ;;  %1473 = vmatprep.subr.bf16.mxu1 %v1472_v41  ;;  %v330_v45 = vld [vmem:[#allocation11 + $0x70] sm:$0xff]  ;;  %v1527_v40 = vpack.c.bf16 %v913_v39, %v912_v38 }
 0x122   :  { %1499 = vmatprep.subr.bf16.mxu0 %v1932_v29  ;;  %v1480_v47 = vpack.c.bf16 %v331_v46, %v330_v45 }
 0x124   :  { %1475 = vmatpush3.bf16.msra.mxu1 %v1472_v41  ;;  %v914_v41 = vld [vmem:[#allocation17 + $0x70] sm:$0xff] }
 0x125   :  { %1501 = vmatpush3.bf16.msra.mxu0 %v1500_v50  ;;  %1477 = vmatprep.subr.bf16.mxu1 %v1476_v44  ;;  %v1530_v43 = vpack.c.bf16 %v915_v42, %v914_v41 }
 0x126   :  { %1502 = vmatprep.subr.bf16.mxu0 %v1932_v29 }
 0x128   :  { %1479 = vmatpush3.bf16.msra.mxu1 %v1476_v44 }
 0x129   :  { %1504 = vmatpush3.bf16.msra.mxu0 %v1503_v57  ;;  %1481 = vmatprep.subr.bf16.mxu1 %v1480_v47 }
 0x12a   :  { %1505 = vmatprep.subr.bf16.mxu0 %v1932_v29 }
 0x12c   :  { %1483 = vmatpush3.bf16.msra.mxu1 %v1480_v47 }
 0x12d   :  { %1507 = vmatpush3.bf16.msra.mxu0 %v1506_v61  ;;  %1375 = vmatprep.subr.mxu1 %v1934_v33 }
 0x12e   :  { %1365 = vmatprep.subr.mxu0 %v1934_v33 }
 0x12f   :  { %1328 = vmatmul.mubr.f32.vlgmr.msra.gmra.mrb[0].mxu1 %v215_v48 }
 0x130   :  { %1363 = vmatmul.mubr.f32.vlgmr.msra.gmra.mrb[2].mxu0 %v453_v62  ;;  %1377 = vmatprep.mubr.msk.f32.mxu1 %vm1933_vm0, %v1934_v33 }
 0x131   :  { %1367 = vmatprep.mubr.msk.f32.mxu0 %vm1933_vm0, %v1934_v33 }
 0x1e3   :  { %v1294_v0 = vpop.f32.mrb[0].mxu0 }
 0x1e4   :  { %v307_v1 = vpop.f32.mrb[1].mxu0  ;;  %v313_v19 = vadd.f32 %v1294_v0, %v1171_v63 }
 0x1e5   :  { %v308_v2 = vadd.f32 %v1171_v63, %v307_v1 }
 0x1e7   :  { %1366 = vmatpush3.xpose.msra.mxu0 %v308_v2 }
 0x1e8   :  { %1370 = vmatprep.subr.mxu0 %v1934_v33 }
 0x203   :  { %v521_v7 = vpop.f32.mrb[2].mxu0 }
 0x204   :  { %v522_v8 = vadd.f32 %v1173_v6, %v521_v7  ;;  %v1364_v9 = vpop.f32.mrb[3].mxu0  ;;  %v1329_v6 = vpop.f32.mrb[0].mxu1  ;;  %v1172_v7 = vld [vmem:[#allocation13] ss:$0 sm:$0xff] }
 0x205   :  { %v411_v9 = vadd.f32 %v1329_v6, %v1172_v7 }
 0x206   :  { %v543_v10 = vrot.slane %v522_v8, %v2230_v56  ;;  %v405_v8 = vpop.f32.mrb[1].mxu1 }
 0x208   :  { %v544_v12 = vcombine.high %v543_v10, %v543_v10  ;;  %v551_v13 = vrot.slane %v543_v10, %v2230_v56  ;;  %v406_v10 = vadd.f32 %v1172_v7, %v405_v8 }
 0x20a   :  { %v558_v15 = vrot.slane %v544_v12, %v2230_v56  ;;  %v562_v16 = vrot.slane %v551_v13, %v2247_v11  ;;  %1376 = vmatpush3.msra.mxu1 %v406_v10 }
 0x20b   :  { %1380 = vmatprep.subr.mxu1 %v1934_v33 }
 0x20c   :  { %v566_v17 = vrot.slane %v558_v15, %v2247_v11  ;;  %v569_v18 = vmul.f32 %v2251_v14, %v562_v16 }
 0x20e   :  { %1368 = vmatmul.mubr.f32.vlgmr.msra.gmra.mrb[4].mxu0 %v569_v18  ;;  %v570_v20 = vmul.f32 %v2251_v14, %v566_v17  ;;  %v900_v17 = vld [vmem:[#allocation17] sm:$0xff]  ;;  %v901_v18 = vld [vmem:[#allocation17 + $0x8] sm:$0xff] }
 0x20f   :  { %1371 = vmatpush3.xpose.msra.mxu0 %v313_v19  ;;  %1372 = vmatprep.mubr.msk.f32.mxu0 %vm1933_vm0, %v1934_v33 }
 0x212   :  { %1373 = vmatmul.mubr.f32.vlgmr.msra.gmra.mrb[6].mxu0 %v570_v20  ;;  %v1509_v20 = vpack.c.bf16 %v901_v18, %v900_v17 }
 0x2e1   :  { %v637_v50 = vpop.f32.mrb[4].mxu0 }
 0x2e2   :  { %v1369_v53 = vpop.f32.mrb[5].mxu0  ;;  %v712_v54 = vsel %vm711_vm4, %v637_v50, -inf }
 0x2e3   :  { %713 = vmax.xlane.f32.xlu0 %v712_v54 }
 0x2e5   :  { %v707_v55 = vpop.f32.mrb[6].mxu0 }
 0x2e6   :  { %v1374_v57 = vpop.f32.mrb[7].mxu0  ;;  %v715_v58 = vsel %vm711_vm4, %v707_v55, -inf }
 0x2e7   :  { %716 = vmax.xlane.f32.xlu0 %v715_v58 }
 0x370   :  { %v714_v59 = vpop.xlane.xlu0 %713 }
 0x371   :  { %v718_v60 = vsub.f32 %v637_v50, %v714_v59 }
 0x373   :  { %v720_v61 = vmul.f32 1.442695, %v718_v60 }
 0x374   :  { %v717_v62 = vpop.xlane.xlu0 %716 }
 0x375   :  { %1557 = vpow2.f32 %v720_v61  ;;  %v719_v63 = vsub.f32 %v707_v55, %v717_v62 }
 0x377   :  { %v722_v0 = vmul.f32 1.442695, %v719_v63 }
 0x379   :  { %1559 = vpow2.f32 %v722_v0 }
 0x37f   :  { %v1558_v1 = vpop.eup %1557 }
 0x380   :  { %v724_v2 = vsel %vm711_vm4, %v1558_v1, 0.0 }
 0x381   :  { %725 = vadd.xlane.f32.xlu1 %v724_v2 }
 0x383   :  { %v1560_v3 = vpop.eup %1559 }
 0x384   :  { %v727_v5 = vsel %vm711_vm4, %v1560_v3, 0.0 }
 0x385   :  { %728 = vadd.xlane.f32.xlu1 %v727_v5  ;;  %v1177_v5 = vld [vmem:[#allocation19] ss:$0 sm:$0xff] }
 0x40e   :  { %v726_v12 = vpop.xlane.xlu1 %725 }
 0x40f   :  { %1561 = vrcp.f32 %v726_v12 }
 0x412   :  { %v729_v13 = vpop.xlane.xlu1 %728 }
 0x413   :  { %1563 = vrcp.f32 %v729_v13 }
 0x419   :  { %v1562_v15 = vpop.eup %1561 }
 0x41a   :  { %v732_v16 = vmul.f32 %v1562_v15, %v1558_v1 }
 0x41c   :  { %734 = vst.msk [vmem:[#allocation24] sm:$0xf] %vm711_vm4, %v732_v16  ;;  %1378 = vmatmul.mubr.msk.f32.vlgmr.msra.gmra.mrb[2].mxu1 %vm736_vm5, %v732_v16 }
 0x41d   :  { %v1564_v19 = vpop.eup %1563  ;;  %1381 = vmatpush3.msra.mxu1 %v411_v9  ;;  %1382 = vmatprep.mubr.msk.f32.mxu1 %vm1933_vm0, %v1934_v33 }
 0x41e   :  { %v733_v21 = vmul.f32 %v1564_v19, %v1560_v3  ;;  %1508 = vmatprep.subr.bf16.mxu1 %v1932_v29 }
 0x420   :  { %735 = vst.msk [vmem:[#allocation24 + $0x4] sm:$0xf] %vm711_vm4, %v733_v21  ;;  %1383 = vmatmul.mubr.msk.f32.vlgmr.msra.gmra.mrb[4].mxu1 %vm736_vm5, %v733_v21 }
 0x421   :  { %1510 = vmatpush3.bf16.msra.mxu1 %v1509_v20  ;;  %1417 = vmatprep.mubr.msk.f32.mxu1 %vm1933_vm0, %v1934_v33  ;;  %v1521_v33 = vpack.c.bf16 %v909_v34, %v908_v32  ;;  %v1055_v20 = vsub.s32 1, %v2220_v49 }
 0x422   :  { %1511 = vmatprep.subr.bf16.mxu1 %v1932_v29 }
 0x425   :  { %1513 = vmatpush3.bf16.msra.mxu1 %v1512_v24 }
 0x426   :  { %1514 = vmatprep.subr.bf16.mxu1 %v1932_v29 }
 0x429   :  { %1516 = vmatpush3.bf16.msra.mxu1 %v1515_v27 }
 0x42a   :  { %1517 = vmatprep.subr.bf16.mxu1 %v1932_v29 }
 0x42d   :  { %1519 = vmatpush3.bf16.msra.mxu1 %v1518_v31 }
 0x42e   :  { %1520 = vmatprep.subr.bf16.mxu1 %v1932_v29 }
 0x431   :  { %1522 = vmatpush3.bf16.msra.mxu1 %v1521_v33 }
 0x432   :  { %1523 = vmatprep.subr.bf16.mxu1 %v1932_v29 }
 0x435   :  { %1525 = vmatpush3.bf16.msra.mxu1 %v1524_v37 }
 0x436   :  { %1526 = vmatprep.subr.bf16.mxu1 %v1932_v29 }
 0x439   :  { %1528 = vmatpush3.bf16.msra.mxu1 %v1527_v40 }
 0x43a   :  { %1529 = vmatprep.subr.bf16.mxu1 %v1932_v29 }
 0x43d   :  { %1531 = vmatpush3.bf16.msra.mxu1 %v1530_v43 }
 0x4ef   :  { %v806_v44 = vpop.f32.mrb[2].mxu1 }
 0x4f0   :  { %v883_v45 = vmul.f32 %v2251_v14, %v806_v44  ;;  %v1379_v46 = vpop.f32.mrb[3].mxu1 }
 0x4f2   :  { %v886_v47 = vsel %vm885_vm6, %v883_v45, 0.0 }
 0x4f3   :  { %v887_v48 = vrot.slane %v886_v47, 4  ;;  %v879_v50 = vpop.f32.mrb[4].mxu1 }
 0x4f4   :  { %v884_v53 = vmul.f32 %v2251_v14, %v879_v50  ;;  %v1384_v54 = vpop.f32.mrb[5].mxu1 }
 0x4f5   :  { %v888_v55 = vadd.f32 %v887_v48, %v886_v47 }
 0x4f6   :  { %v893_v57 = vsel %vm885_vm6, %v884_v53, 0.0 }
 0x4f7   :  { %v889_v58 = vrot.slane %v888_v55, 2  ;;  %v894_v59 = vrot.slane %v893_v57, 4 }
 0x4f9   :  { %v890_v29 = vadd.f32 %v889_v58, %v888_v55  ;;  %v895_v60 = vadd.f32 %v894_v59, %v893_v57 }
 0x4fb   :  { %v896_v61 = vrot.slane %v895_v60, 2  ;;  %v891_v62 = vrot.slane %v890_v29, 1 }
 0x4fd   :  { %v897_v63 = vadd.f32 %v896_v61, %v895_v60  ;;  %v892_v1 = vadd.f32 %v891_v62, %v890_v29 }
 0x4ff   :  { %v898_v0 = vrot.slane %v897_v63, 1 }
 0x501   :  { %v899_v2 = vadd.f32 %v898_v0, %v897_v63 }
 0x503   :  { %v926_v3 = vsel %vm925_vm7, %v899_v2, %v892_v1 }
 0x504   :  { %1418 = vmatmul.mubr.f32.vlgmr.msra.gmra.mrb[6].mxu1 %v926_v3 }
 0x5d7   :  { %v994_v6 = vpop.f32.mrb[6].mxu1 }
 0x5d8   :  { %v995_v7 = vadd.f32 %v1177_v5, %v994_v6  ;;  %v1419_v14 = vpop.f32.mrb[7].mxu1 }
 0x5da   :  { %v1005_v8 = vrot.slane %v995_v7, %v2230_v56 }
 0x5dc   :  { %v1006_v9 = vcombine.high %v1005_v8, %v1005_v8  ;;  %v1013_v10 = vrot.slane %v1005_v8, %v2230_v56 }
 0x5de   :  { %v1020_v12 = vrot.slane %v1006_v9, %v2230_v56  ;;  %v1023_v13 = vadd.f32 %v1013_v10, %v2222_v51 }
 0x5e0   :  { %v1024_v15 = vadd.f32 %v1020_v12, %v2224_v52 }
 0x5e2   :  { %v1027_v16 = vcombine.low %v1023_v13, %v1024_v15 }
 0x5e4   :  { %v1034_v17 = vrot.slane %v1027_v16, %v2230_v56 }
 0x5e6   :  { %v1041_v18 = vrot.slane %v1034_v17, %v2230_v56 }
 0x5e8   :  { %v1044_v19 = vsel %vm1043_vm8, %v1041_v18, 0.0 }
 0x5e9   :  { %1045 = vadd.xlane.f32.xlu0 %v1044_v19 }
 0x676   :  { %v1046_v21 = vpop.xlane.xlu0 %1045 }
 0x677   :  { %v1047_v22 = vmul.f32 0.03125, %v1046_v21 }
 0x679   :  { %v1052_v23 = vrot.slane %v1047_v22, %v2247_v11  ;;  %v1056_v24 = vrot.slane %v1047_v22, %v1055_v20 }
 0x67b   :  { %v1059_v25 = vsub.f32 %v1023_v13, %v1052_v23  ;;  %v1060_v51 = vsub.f32 %v1024_v15, %v1056_v24 }
 0x67d   :  { %v1064_v26 = vcombine.low %v1059_v25, %v1060_v51 }
 0x67f   :  { %v1071_v52 = vrot.slane %v1064_v26, %v2230_v56 }
 0x681   :  { %v1078_v27 = vrot.slane %v1071_v52, %v2230_v56 }
 0x683   :  { %v1080_v28 = vsel %vm1061_vm9, %v1078_v27, 0.0 }
 0x684   :  { %v1081_v30 = vmul.f32 %v1080_v28, %v1080_v28 }
 0x686   :  { %v1082_v31 = vsel %vm1043_vm8, %v1081_v30, 0.0 }
 0x687   :  { %1083 = vadd.xlane.f32.xlu1 %v1082_v31 }
 0x688   :  { %1864 = shalt.err (!%p1861_p10)
}
 0x689   :  { %s1865_s27 = scalar_lea.hbm %s2340_s14, 128 }
 0x68a   :  { %p1866_p11 = scmp.ne.s32.totalorder %s2340_s14, %s1865_s27  ;;  %p1869_p12 = scmp.lt.u32.totalorder %s1865_s27, %s2340_s14 }
 0x68c   :  { %p1871_p13 = pnand %p1869_p12, %p1866_p11 }
 0x68e   :  { %1874 = shalt.err (!%p1871_p13)
}
 0x68f   :  { %s1937_s4 = smov 64   ;;  %s1938_s28 = smov 4   ;;  %v1178_v34 = vld [vmem:[#allocation20] ss:$0 sm:$0xff]  ;;  %v1179_v35 = vld [vmem:[#allocation22] ss:$0 sm:$0xff] }
 0x690   :  { %1155 = dma.vmem_to_hbm [thread:$0]  %s1150_s1, 128, %s2340_s14, [#allocation25], %s1937_s4, %s1937_s4, %s1938_s28  }
 0x691   :  { %s1939_s5 = smov [#allocation23]  }
 0x692   :  { %s1137_s24 = sshll.u32 %s1939_s5, 4  ;;  %s1138_s24 = int_to_ptr.vmem [resolvable:$true] %s1137_s24 }
 0x693   :  { %s1875_s3 = scalar_lea.vmem %s1138_s24, 32  ;;  %p1880_p1 = scmp.lt.s32.totalorder %s1138_s24, %s1138_s24 }
 0x694   :  { %p1876_p0 = scmp.ne.s32.totalorder %s1138_s24, %s1875_s3  ;;  %p1881_p2 = scmp.lt.s32.totalorder %s1875_s3, %s1875_s3 }
 0x696   :  { %p1882_p3 = por %p1881_p2, %p1880_p1 }
 0x698   :  { %p1883_p4 = pnand %p1882_p3, %p1876_p0 }
 0x714   :  { %v1084_v49 = vpop.xlane.xlu1 %1083 }
 0x715   :  { %v1085_v4 = vmul.f32 0.03125, %v1084_v49 }
 0x717   :  { %v1086_v11 = vadd.f32 1e-05, %v1085_v4 }
 0x719   :  { %1565 = vrsqrt.f32 %v1086_v11 }
 0x723   :  { %v1566_v32 = vpop.eup %1565 }
 0x724   :  { %v1088_v33 = vmul.f32 %v1566_v32, %v1080_v28 }
 0x726   :  { %v1096_v36 = vmul.f32 %v1178_v34, %v1088_v33 }
 0x728   :  { %v1104_v37 = vadd.f32 %v1179_v35, %v1096_v36 }
 0x72a   :  { %v1112_v38 = vrot.slane %v1104_v37, %v2230_v56 }
 0x72c   :  { %v1113_v39 = vcombine.high %v1112_v38, %v1112_v38  ;;  %1180 = vst.sshfl [vmem:[#allocation23] sm:$0x1 pattern:$0x73625140] %v1112_v38 }
 0x72e   :  { %1181 = vst.sshfl [vmem:[#allocation23 + $0x1] sm:$0x1 pattern:$0x73625140] %v1113_v39 }
 0x72f   :  { %1886 = shalt.err (!%p1883_p4)
}
 0x730   :  { %s1887_s21 = scalar_lea.hbm %s2339_s13, 32 }
 0x731   :  { %p1888_p5 = scmp.ne.s32.totalorder %s2339_s13, %s1887_s21  ;;  %p1891_p6 = scmp.lt.u32.totalorder %s1887_s21, %s2339_s13 }
 0x733   :  { %p1893_p7 = pnand %p1891_p6, %p1888_p5 }
 0x735   :  { %1896 = shalt.err (!%p1893_p7)
}
 0x736   :  { %1143 = dma.vmem_to_hbm [thread:$0]  %s1138_s24, 32, %s2339_s13, [#allocation4], %s1925_s0, %s1925_s0, %s1926_s25  }
 0x737   :  { %1911 = dma.done.wait [#allocation4], 32  }
 0x738   :  { %1912 = vsyncadd [#allocation4], 4294967264 }
 0x739   :  { %1913 = dma.done.wait [#allocation25], 128  }
 0x73a   :  { %1914 = vsyncadd [#allocation25], 4294967168 }
 0x73b   :  { %1162 = vsyncpa [#allocation3], 1 }
 0x73c   :  { %1163 = vsyncpa [#allocation6], 1 }
 0x73d   :  { %1164 = vsyncpa [#allocation9], 1 }
 0x73e   :  { %1165 = vsyncpa [#allocation12], 1 }
 0x73f   :  { %1166 = vsyncpa [#allocation15], 1 }
 0x740   :  { %1167 = vsyncpa [#allocation18], 1 }
 0x741   :  { %1168 = vsyncpa [#allocation21], 1 }
 0x742   :  { %1169 = vsyncpa [#allocation4], 1 }
 0x743   :  { %1170 = vsyncpa [#allocation25], 1 }

</bundles_post_ra>
